<compile_context>
chip_gen: v5e
topology: v5e:2x2
jax: 0.10.0
libtpu: 0.0.40
codegen_flags: <defaults>
</compile_context>

<pallas_src>
import jax
import jax.numpy as jnp
from jax.experimental import pallas as pl
from jax.experimental.pallas import tpu as pltpu

# ----------------------- NSCL "definitions" (from __init__) -----------------------
DEFINITIONS = {
    "color":    ["red", "green", "blue", "yellow"],
    "shape":    ["cube", "sphere", "cylinder"],
    "size":     ["small", "large"],
    "material": ["rubber", "metal"],
}
ATTR_NAMES = tuple(DEFINITIONS.keys())
CONCEPT_COUNTS = tuple(len(v) for v in DEFINITIONS.values())
TOTAL_CONCEPTS = sum(CONCEPT_COUNTS)          # 11
N_ATTR = len(ATTR_NAMES)                      # 4
MAX_C = 8                                     # per-attribute concept padding

INPUT_DIM = 256                               # module default
EMB_DIM = 64                                  # module default
TAU = 0.1                                     # concept-similarity temperature
ANN_PAD = 128                                 # lane-dense padded concept axis


# ------------------------------- Fused NSCL kernel --------------------------------
def _nscl_kernel(img_ref, scene_ref, q_ref,
                 w_img_ref, w_scene_ref, b_ref, w_attr_ref,
                 wc_ref, g_ref, s_ref, mask_ref,
                 ann_ref, ans_ref):
    # img_ref:   [Bt, C, H*W]            native NCHW layout, HW on lanes (lane-dense)
    # scene_ref: [Bt, N_OBJ, S]          per-object scene descriptors
    # q_ref:     [Bt, 1, ANN_PAD]        soft concept-selection weights ("question"), zero-padded
    # w_img:     [C, INPUT_DIM]          pointwise image projection
    # w_scene:   [S, INPUT_DIM]          per-object projection
    # b_ref:     [1, INPUT_DIM]
    # w_attr:    [INPUT_DIM, N_ATTR*EMB_DIM]   stacked per-attribute projections
    # wc_ref:    [N_ATTR*EMB_DIM, ANN_PAD]     block-diag of L2-normalized concept embeddings
    # g_ref:     [N_ATTR*EMB_DIM, ANN_PAD]     block-diag 1s -> per-attribute-chunk sum of squares
    # s_ref:     [ANN_PAD, ANN_PAD]            block-diag 1s -> per-attribute softmax group sums
    # mask_ref:  [1, ANN_PAD]                  0 for real concepts, -1e9 for padded columns
    # ann_ref:   [Bt, N_OBJ, ANN_PAD]          per-object concept probabilities (padded)
    # ans_ref:   [Bt, 1, ANN_PAD]              per-concept answer contributions (summed over objects)
    bt = img_ref.shape[0]
    n_obj = scene_ref.shape[1]

    # ---- VisualModule: pool first, project second (mean(pix @ W) == mean(pix) @ W) ----
    pooled = jnp.mean(img_ref[...], axis=2)                               # [Bt, C]
    img_feat = jnp.dot(pooled, w_img_ref[...],
                       preferred_element_type=jnp.float32)                # [Bt, INPUT_DIM]

    scene2d = scene_ref[...].reshape(bt * n_obj, scene_ref.shape[2])      # [Bt*N, S]
    obj = jnp.dot(scene2d, w_scene_ref[...],
                  preferred_element_type=jnp.float32)                     # [Bt*N, INPUT_DIM]
    vf = obj.reshape(bt, n_obj, INPUT_DIM) + img_feat[:, None, :] + b_ref[...]
    vf = jnp.maximum(vf, 0.0).reshape(bt * n_obj, INPUT_DIM)              # [Bt*N, INPUT_DIM]

    # ---- AttributeEmbeddingSpace: all attributes in one lane-dense pass ----
    emb = jnp.dot(vf, w_attr_ref[...],
                  preferred_element_type=jnp.float32)                     # [Bt*N, N_ATTR*EMB]
    raw = jnp.dot(emb, wc_ref[...],
                  preferred_element_type=jnp.float32)                     # [Bt*N, ANN_PAD]
    sumsq = jnp.dot(emb * emb, g_ref[...],
                    preferred_element_type=jnp.float32)                   # per-chunk ||ok||^2
    cos = raw * jax.lax.rsqrt(sumsq + 1e-6)                               # cosine similarity
    logits = cos * (1.0 / TAU) + mask_ref[...]                            # mask padded columns
    z = logits - jnp.max(logits, axis=-1, keepdims=True)                  # safe shift (per-row)
    e = jnp.exp(z)
    gsum = jnp.dot(e, s_ref[...],
                   preferred_element_type=jnp.float32)                    # per-attribute group sums
    p = e * pl.reciprocal(gsum + 1e-30, approx=True)                      # per-attribute softmax

    p3 = p.reshape(bt, n_obj, ANN_PAD)
    ann_ref[...] = p3                                                     # single lane-dense store

    # ---- ReasoningModule: soft filter-count (question-weighted concept mass) ----
    # TODO(synk): the original ReasoningModule executes arbitrary symbolic programs;
    # only a single soft filter-count style program is implemented here.
    ans_ref[...] = jnp.sum(p3 * q_ref[...], axis=1, keepdims=True)        # [Bt, 1, ANN_PAD]


# ----------------------------------- Wrapper --------------------------------------
def _build_concept_tables(e_concepts):
    """Precompute batch-independent concept tables (done once, outside the kernel)."""
    e_norm = e_concepts * jax.lax.rsqrt(
        jnp.sum(e_concepts * e_concepts, axis=-1, keepdims=True) + 1e-6)
    wc = jnp.zeros((N_ATTR * EMB_DIM, ANN_PAD), jnp.float32)
    g = jnp.zeros((N_ATTR * EMB_DIM, ANN_PAD), jnp.float32)
    s = jnp.zeros((ANN_PAD, ANN_PAD), jnp.float32)
    mask = jnp.full((1, ANN_PAD), -1e9, jnp.float32)
    off = 0
    for k, n_c in enumerate(CONCEPT_COUNTS):
        r0, r1 = k * EMB_DIM, (k + 1) * EMB_DIM
        wc = wc.at[r0:r1, off:off + n_c].set(jnp.transpose(e_norm[k, :n_c, :]))
        g = g.at[r0:r1, off:off + n_c].set(1.0)
        s = s.at[off:off + n_c, off:off + n_c].set(1.0)
        mask = mask.at[:, off:off + n_c].set(0.0)
        off += n_c
    return wc, g, s, mask


def nscl_forward(image, question, scene, params):
    B, C, H, W = image.shape
    n_obj, S = scene.shape[1], scene.shape[2]
    HW = H * W

    img = image.reshape(B, C, HW).astype(jnp.float32)        # keep native layout, HW on lanes
    scene = scene.astype(jnp.float32)
    q_pad = jnp.zeros((B, 1, ANN_PAD), jnp.float32)
    q_pad = q_pad.at[:, 0, :TOTAL_CONCEPTS].set(question.astype(jnp.float32))

    wc, g, s, mask = _build_concept_tables(params["e_concepts"])

    # Grid: 2 parallel steps (both v7x TensorCores busy; only one extra step on v5e/v6e).
    num_steps = 2 if B >= 2 else 1
    bt = pl.cdiv(B, num_steps)
    b_pad = num_steps * bt
    if b_pad != B:
        pad = b_pad - B
        img = jnp.pad(img, ((0, pad), (0, 0), (0, 0)))
        scene = jnp.pad(scene, ((0, pad), (0, 0), (0, 0)))
        q_pad = jnp.pad(q_pad, ((0, pad), (0, 0), (0, 0)))

    bcast2 = lambda b: (0, 0)
    annotations_pad, ans_contrib = pl.pallas_call(
        _nscl_kernel,
        out_shape=(
            jax.ShapeDtypeStruct((b_pad, n_obj, ANN_PAD), jnp.float32),
            jax.ShapeDtypeStruct((b_pad, 1, ANN_PAD), jnp.float32),
        ),
        grid=(num_steps,),
        in_specs=[
            pl.BlockSpec((bt, C, HW), lambda b: (b, 0, 0)),
            pl.BlockSpec((bt, n_obj, S), lambda b: (b, 0, 0)),
            pl.BlockSpec((bt, 1, ANN_PAD), lambda b: (b, 0, 0)),
            pl.BlockSpec((C, INPUT_DIM), bcast2),
            pl.BlockSpec((S, INPUT_DIM), bcast2),
            pl.BlockSpec((1, INPUT_DIM), bcast2),
            pl.BlockSpec((INPUT_DIM, N_ATTR * EMB_DIM), bcast2),
            pl.BlockSpec((N_ATTR * EMB_DIM, ANN_PAD), bcast2),
            pl.BlockSpec((N_ATTR * EMB_DIM, ANN_PAD), bcast2),
            pl.BlockSpec((ANN_PAD, ANN_PAD), bcast2),
            pl.BlockSpec((1, ANN_PAD), bcast2),
        ],
        out_specs=(
            pl.BlockSpec((bt, n_obj, ANN_PAD), lambda b: (b, 0, 0)),
            pl.BlockSpec((bt, 1, ANN_PAD), lambda b: (b, 0, 0)),
        ),
        compiler_params=pltpu.CompilerParams(dimension_semantics=("parallel",)),
    )(img, scene, q_pad,
      params["w_img"], params["w_scene"], params["b_vis"], params["w_attr"],
      wc, g, s, mask)

    annotations = annotations_pad[:B, :, :TOTAL_CONCEPTS]
    answers = jnp.sum(ans_contrib[:B, 0, :], axis=-1)
    return annotations, answers


def init_params(key, channels, scene_dim):
    k1, k2, k3, k4, k5 = jax.random.split(key, 5)
    return {
        "w_img":      0.05 * jax.random.normal(k1, (channels, INPUT_DIM), jnp.float32),
        "w_scene":    0.05 * jax.random.normal(k2, (scene_dim, INPUT_DIM), jnp.float32),
        "b_vis":      0.01 * jax.random.normal(k3, (1, INPUT_DIM), jnp.float32),
        "w_attr":     0.05 * jax.random.normal(k4, (INPUT_DIM, N_ATTR * EMB_DIM), jnp.float32),
        "e_concepts": jax.random.normal(k5, (N_ATTR, MAX_C, EMB_DIM), jnp.float32),
    }


if __name__ == "__main__":
    key = jax.random.PRNGKey(0)
    k_img, k_scene, k_q, k_p = jax.random.split(key, 4)

    B, C, H, W = 2, 4, 16, 16
    N_OBJ, SCENE_DIM = 8, 32

    image = jax.random.normal(k_img, (B, C, H, W), jnp.float32)           # NCHW like PyTorch
    scene = jax.random.normal(k_scene, (B, N_OBJ, SCENE_DIM), jnp.float32)
    question = jax.random.uniform(k_q, (B, TOTAL_CONCEPTS), jnp.float32)  # soft concept weights

    params = init_params(k_p, C, SCENE_DIM)

    annotations, answers = jax.jit(nscl_forward)(image, question, scene, params)
    jax.block_until_ready((annotations, answers))

    assert annotations.shape == (B, N_OBJ, TOTAL_CONCEPTS)
    assert answers.shape == (B,)
    assert bool(jnp.all(jnp.isfinite(annotations))) and bool(jnp.all(jnp.isfinite(answers)))
    # each object's probabilities should sum to ~1 per attribute -> N_ATTR total
    total_mass = jnp.sum(annotations, axis=-1)
    assert bool(jnp.all(jnp.abs(total_mass - float(N_ATTR)) < 1e-2))
    print("KERNEL_OK")
</pallas_src>

<mosaic_0001>
module attributes {stable_mosaic.version = 11 : i64} {
  func.func @_nscl_kernel(%arg0: i32, %arg1: memref<1x4x256xf32, #tpu.memory_space<vmem>>, %arg2: memref<1x8x32xf32, #tpu.memory_space<vmem>>, %arg3: memref<1x1x128xf32, #tpu.memory_space<vmem>>, %arg4: memref<4x256xf32, #tpu.memory_space<vmem>>, %arg5: memref<32x256xf32, #tpu.memory_space<vmem>>, %arg6: memref<1x256xf32, #tpu.memory_space<vmem>>, %arg7: memref<256x256xf32, #tpu.memory_space<vmem>>, %arg8: memref<256x128xf32, #tpu.memory_space<vmem>>, %arg9: memref<256x128xf32, #tpu.memory_space<vmem>>, %arg10: memref<128x128xf32, #tpu.memory_space<vmem>>, %arg11: memref<1x128xf32, #tpu.memory_space<vmem>>, %arg12: memref<1x8x128xf32, #tpu.memory_space<vmem>>, %arg13: memref<1x1x128xf32, #tpu.memory_space<vmem>>) attributes {dimension_semantics = [#tpu.dimension_semantics<parallel>], iteration_bounds = array<i64: 2>, scalar_prefetch = 0 : i64, scratch_operands = 0 : i64, tpu.core_type = #tpu.core_type<tc>, window_params = [{transform_indices = @transform_0, window_bounds = array<i64: 1, 4, 256>}, {transform_indices = @transform_1, window_bounds = array<i64: 1, 8, 32>}, {transform_indices = @transform_2, window_bounds = array<i64: 1, 1, 128>}, {pipeline_mode = #tpu.pipeline_mode<synchronous>, transform_indices = @transform_3, window_bounds = array<i64: 4, 256>}, {pipeline_mode = #tpu.pipeline_mode<synchronous>, transform_indices = @transform_4, window_bounds = array<i64: 32, 256>}, {pipeline_mode = #tpu.pipeline_mode<synchronous>, transform_indices = @transform_5, window_bounds = array<i64: 1, 256>}, {pipeline_mode = #tpu.pipeline_mode<synchronous>, transform_indices = @transform_6, window_bounds = array<i64: 256, 256>}, {pipeline_mode = #tpu.pipeline_mode<synchronous>, transform_indices = @transform_7, window_bounds = array<i64: 256, 128>}, {pipeline_mode = #tpu.pipeline_mode<synchronous>, transform_indices = @transform_8, window_bounds = array<i64: 256, 128>}, {pipeline_mode = #tpu.pipeline_mode<synchronous>, transform_indices = @transform_9, window_bounds = array<i64: 128, 128>}, {pipeline_mode = #tpu.pipeline_mode<synchronous>, transform_indices = @transform_10, window_bounds = array<i64: 1, 128>}, {transform_indices = @transform_11, window_bounds = array<i64: 1, 8, 128>}, {transform_indices = @transform_12, window_bounds = array<i64: 1, 1, 128>}]} {
    %c0 = arith.constant 0 : index
    %c0_0 = arith.constant 0 : index
    %c0_1 = arith.constant 0 : index
    %0 = vector.load %arg1[%c0, %c0_0, %c0_1] : memref<1x4x256xf32, #tpu.memory_space<vmem>>, vector<1x4x256xf32>
    %cst = arith.constant dense<0.000000e+00> : vector<1x4xf32>
    %1 = vector.multi_reduction <add>, %0, %cst [2] : vector<1x4x256xf32> to vector<1x4xf32>
    %cst_2 = arith.constant 2.560000e+02 : f32
    %2 = vector.broadcast %cst_2 : f32 to vector<1x4xf32>
    %3 = arith.divf %1, %2 : vector<1x4xf32>
    %c0_3 = arith.constant 0 : index
    %c0_4 = arith.constant 0 : index
    %4 = vector.load %arg4[%c0_3, %c0_4] : memref<4x256xf32, #tpu.memory_space<vmem>>, vector<4x256xf32>
    %cst_5 = arith.constant dense<0.000000e+00> : vector<1x256xf32>
    %5 = tpu.matmul %3, %4, %cst_5 {dimension_numbers = #tpu.dot_dimension_numbers<[1], [0], [0], [1], [0, 0, 1, 1], [], []>} : vector<1x4xf32>, vector<4x256xf32>, vector<1x256xf32> -> vector<1x256xf32>
    %c0_6 = arith.constant 0 : index
    %c0_7 = arith.constant 0 : index
    %c0_8 = arith.constant 0 : index
    %6 = vector.load %arg2[%c0_6, %c0_7, %c0_8] : memref<1x8x32xf32, #tpu.memory_space<vmem>>, vector<1x8x32xf32>
    %7 = vector.shape_cast %6 : vector<1x8x32xf32> to vector<8x32xf32>
    %c0_9 = arith.constant 0 : index
    %c0_10 = arith.constant 0 : index
    %8 = vector.load %arg5[%c0_9, %c0_10] : memref<32x256xf32, #tpu.memory_space<vmem>>, vector<32x256xf32>
    %cst_11 = arith.constant dense<0.000000e+00> : vector<8x256xf32>
    %9 = tpu.matmul %7, %8, %cst_11 {dimension_numbers = #tpu.dot_dimension_numbers<[1], [0], [0], [1], [0, 0, 1, 1], [], []>} : vector<8x32xf32>, vector<32x256xf32>, vector<8x256xf32> -> vector<8x256xf32>
    %10 = vector.shape_cast %9 : vector<8x256xf32> to vector<1x8x256xf32>
    %11 = vector.shape_cast %5 : vector<1x256xf32> to vector<1x1x256xf32>
    %12 = vector.broadcast %11 : vector<1x1x256xf32> to vector<1x8x256xf32>
    %13 = arith.addf %10, %12 : vector<1x8x256xf32>
    %c0_12 = arith.constant 0 : index
    %c0_13 = arith.constant 0 : index
    %14 = vector.load %arg6[%c0_12, %c0_13] : memref<1x256xf32, #tpu.memory_space<vmem>>, vector<1x256xf32>
    %15 = vector.shape_cast %14 : vector<1x256xf32> to vector<1x1x256xf32>
    %16 = vector.broadcast %15 : vector<1x1x256xf32> to vector<1x8x256xf32>
    %17 = arith.addf %13, %16 : vector<1x8x256xf32>
    %cst_14 = arith.constant 0.000000e+00 : f32
    %18 = vector.broadcast %cst_14 : f32 to vector<1x8x256xf32>
    %19 = arith.maximumf %17, %18 : vector<1x8x256xf32>
    %20 = vector.shape_cast %19 : vector<1x8x256xf32> to vector<8x256xf32>
    %c0_15 = arith.constant 0 : index
    %c0_16 = arith.constant 0 : index
    %21 = vector.load %arg7[%c0_15, %c0_16] : memref<256x256xf32, #tpu.memory_space<vmem>>, vector<256x256xf32>
    %cst_17 = arith.constant dense<0.000000e+00> : vector<8x256xf32>
    %22 = tpu.matmul %20, %21, %cst_17 {dimension_numbers = #tpu.dot_dimension_numbers<[1], [0], [0], [1], [0, 0, 1, 1], [], []>} : vector<8x256xf32>, vector<256x256xf32>, vector<8x256xf32> -> vector<8x256xf32>
    %c0_18 = arith.constant 0 : index
    %c0_19 = arith.constant 0 : index
    %23 = vector.load %arg8[%c0_18, %c0_19] : memref<256x128xf32, #tpu.memory_space<vmem>>, vector<256x128xf32>
    %cst_20 = arith.constant dense<0.000000e+00> : vector<8x128xf32>
    %24 = tpu.matmul %22, %23, %cst_20 {dimension_numbers = #tpu.dot_dimension_numbers<[1], [0], [0], [1], [0, 0, 1, 1], [], []>} : vector<8x256xf32>, vector<256x128xf32>, vector<8x128xf32> -> vector<8x128xf32>
    %25 = arith.mulf %22, %22 : vector<8x256xf32>
    %c0_21 = arith.constant 0 : index
    %c0_22 = arith.constant 0 : index
    %26 = vector.load %arg9[%c0_21, %c0_22] : memref<256x128xf32, #tpu.memory_space<vmem>>, vector<256x128xf32>
    %cst_23 = arith.constant dense<0.000000e+00> : vector<8x128xf32>
    %27 = tpu.matmul %25, %26, %cst_23 {dimension_numbers = #tpu.dot_dimension_numbers<[1], [0], [0], [1], [0, 0, 1, 1], [], []>} : vector<8x256xf32>, vector<256x128xf32>, vector<8x128xf32> -> vector<8x128xf32>
    %cst_24 = arith.constant 9.99999997E-7 : f32
    %28 = vector.broadcast %cst_24 : f32 to vector<8x128xf32>
    %29 = arith.addf %27, %28 : vector<8x128xf32>
    %30 = math.rsqrt %29 : vector<8x128xf32>
    %31 = arith.mulf %24, %30 : vector<8x128xf32>
    %cst_25 = arith.constant 1.000000e+01 : f32
    %32 = vector.broadcast %cst_25 : f32 to vector<8x128xf32>
    %33 = arith.mulf %31, %32 : vector<8x128xf32>
    %c0_26 = arith.constant 0 : index
    %c0_27 = arith.constant 0 : index
    %34 = vector.load %arg11[%c0_26, %c0_27] : memref<1x128xf32, #tpu.memory_space<vmem>>, vector<1x128xf32>
    %35 = vector.broadcast %34 : vector<1x128xf32> to vector<8x128xf32>
    %36 = arith.addf %33, %35 : vector<8x128xf32>
    %cst_28 = arith.constant dense<0xFF800000> : vector<8xf32>
    %37 = vector.multi_reduction <maximumf>, %36, %cst_28 [1] : vector<8x128xf32> to vector<8xf32>
    %38 = vector.shape_cast %37 : vector<8xf32> to vector<8x1xf32>
    %39 = vector.broadcast %38 : vector<8x1xf32> to vector<8x128xf32>
    %40 = arith.subf %36, %39 : vector<8x128xf32>
    %41 = math.exp %40 : vector<8x128xf32>
    %c0_29 = arith.constant 0 : index
    %c0_30 = arith.constant 0 : index
    %42 = vector.load %arg10[%c0_29, %c0_30] : memref<128x128xf32, #tpu.memory_space<vmem>>, vector<128x128xf32>
    %cst_31 = arith.constant dense<0.000000e+00> : vector<8x128xf32>
    %43 = tpu.matmul %41, %42, %cst_31 {dimension_numbers = #tpu.dot_dimension_numbers<[1], [0], [0], [1], [0, 0, 1, 1], [], []>} : vector<8x128xf32>, vector<128x128xf32>, vector<8x128xf32> -> vector<8x128xf32>
    %cst_32 = arith.constant 1.000000e-30 : f32
    %44 = vector.broadcast %cst_32 : f32 to vector<8x128xf32>
    %45 = arith.addf %43, %44 : vector<8x128xf32>
    %46 = tpu.reciprocal %45 {approx = true} : vector<8x128xf32> -> vector<8x128xf32>
    %47 = arith.mulf %41, %46 : vector<8x128xf32>
    %48 = vector.shape_cast %47 : vector<8x128xf32> to vector<1x8x128xf32>
    %c0_33 = arith.constant 0 : index
    %c0_34 = arith.constant 0 : index
    %c0_35 = arith.constant 0 : index
    %49 = vector.load %arg12[%c0_33, %c0_34, %c0_35] : memref<1x8x128xf32, #tpu.memory_space<vmem>>, vector<1x8x128xf32>
    tpu.vector_store %arg12[%c0_33, %c0_34, %c0_35], %48 {strides = array<i32>} : memref<1x8x128xf32, #tpu.memory_space<vmem>>, vector<1x8x128xf32>,
    %c0_36 = arith.constant 0 : index
    %c0_37 = arith.constant 0 : index
    %c0_38 = arith.constant 0 : index
    %50 = vector.load %arg3[%c0_36, %c0_37, %c0_38] : memref<1x1x128xf32, #tpu.memory_space<vmem>>, vector<1x1x128xf32>
    %51 = vector.broadcast %50 : vector<1x1x128xf32> to vector<1x8x128xf32>
    %52 = arith.mulf %48, %51 : vector<1x8x128xf32>
    %cst_39 = arith.constant dense<0.000000e+00> : vector<1x128xf32>
    %53 = vector.multi_reduction <add>, %52, %cst_39 [1] : vector<1x8x128xf32> to vector<1x128xf32>
    %54 = vector.shape_cast %53 : vector<1x128xf32> to vector<1x1x128xf32>
    %c0_40 = arith.constant 0 : index
    %c0_41 = arith.constant 0 : index
    %c0_42 = arith.constant 0 : index
    %55 = vector.load %arg13[%c0_40, %c0_41, %c0_42] : memref<1x1x128xf32, #tpu.memory_space<vmem>>, vector<1x1x128xf32>
    tpu.vector_store %arg13[%c0_40, %c0_41, %c0_42], %54 {strides = array<i32>} : memref<1x1x128xf32, #tpu.memory_space<vmem>>, vector<1x1x128xf32>,
    return
  }
  func.func @transform_0(%arg0: i32) -> (i32, i32, i32) {
    %c0_i32 = arith.constant 0 : i32
    %c0_i32_0 = arith.constant 0 : i32
    %c0_i32_1 = arith.constant 0 : i32
    return %arg0, %c0_i32, %c0_i32_0 : i32, i32, i32
  }
  func.func @transform_1(%arg0: i32) -> (i32, i32, i32) {
    %c0_i32 = arith.constant 0 : i32
    %c0_i32_0 = arith.constant 0 : i32
    %c0_i32_1 = arith.constant 0 : i32
    return %arg0, %c0_i32, %c0_i32_0 : i32, i32, i32
  }
  func.func @transform_2(%arg0: i32) -> (i32, i32, i32) {
    %c0_i32 = arith.constant 0 : i32
    %c0_i32_0 = arith.constant 0 : i32
    %c0_i32_1 = arith.constant 0 : i32
    return %arg0, %c0_i32, %c0_i32_0 : i32, i32, i32
  }
  func.func @transform_3(%arg0: i32) -> (i32, i32) {
    %c0_i32 = arith.constant 0 : i32
    %c0_i32_0 = arith.constant 0 : i32
    %c0_i32_1 = arith.constant 0 : i32
    return %c0_i32, %c0_i32_0 : i32, i32
  }
  func.func @transform_4(%arg0: i32) -> (i32, i32) {
    %c0_i32 = arith.constant 0 : i32
    %c0_i32_0 = arith.constant 0 : i32
    %c0_i32_1 = arith.constant 0 : i32
    return %c0_i32, %c0_i32_0 : i32, i32
  }
  func.func @transform_5(%arg0: i32) -> (i32, i32) {
    %c0_i32 = arith.constant 0 : i32
    %c0_i32_0 = arith.constant 0 : i32
    %c0_i32_1 = arith.constant 0 : i32
    return %c0_i32, %c0_i32_0 : i32, i32
  }
  func.func @transform_6(%arg0: i32) -> (i32, i32) {
    %c0_i32 = arith.constant 0 : i32
    %c0_i32_0 = arith.constant 0 : i32
    %c0_i32_1 = arith.constant 0 : i32
    return %c0_i32, %c0_i32_0 : i32, i32
  }
  func.func @transform_7(%arg0: i32) -> (i32, i32) {
    %c0_i32 = arith.constant 0 : i32
    %c0_i32_0 = arith.constant 0 : i32
    %c0_i32_1 = arith.constant 0 : i32
    return %c0_i32, %c0_i32_0 : i32, i32
  }
  func.func @transform_8(%arg0: i32) -> (i32, i32) {
    %c0_i32 = arith.constant 0 : i32
    %c0_i32_0 = arith.constant 0 : i32
    %c0_i32_1 = arith.constant 0 : i32
    return %c0_i32, %c0_i32_0 : i32, i32
  }
  func.func @transform_9(%arg0: i32) -> (i32, i32) {
    %c0_i32 = arith.constant 0 : i32
    %c0_i32_0 = arith.constant 0 : i32
    %c0_i32_1 = arith.constant 0 : i32
    return %c0_i32, %c0_i32_0 : i32, i32
  }
  func.func @transform_10(%arg0: i32) -> (i32, i32) {
    %c0_i32 = arith.constant 0 : i32
    %c0_i32_0 = arith.constant 0 : i32
    %c0_i32_1 = arith.constant 0 : i32
    return %c0_i32, %c0_i32_0 : i32, i32
  }
  func.func @transform_11(%arg0: i32) -> (i32, i32, i32) {
    %c0_i32 = arith.constant 0 : i32
    %c0_i32_0 = arith.constant 0 : i32
    %c0_i32_1 = arith.constant 0 : i32
    return %arg0, %c0_i32, %c0_i32_0 : i32, i32, i32
  }
  func.func @transform_12(%arg0: i32) -> (i32, i32, i32) {
    %c0_i32 = arith.constant 0 : i32
    %c0_i32_0 = arith.constant 0 : i32
    %c0_i32_1 = arith.constant 0 : i32
    return %arg0, %c0_i32, %c0_i32_0 : i32, i32, i32
  }
}

</mosaic_0001>

<bundles_post_ra>
// kernel: nscl_forward.1
= control target key start
LH: loop header
LB: loop body
LE: loop exit
PB: predicated region body
PF: predicated region fallthrough
CT: control target
= control target key end

     0   :  { %s1849_s0 = inlined_call_operand.vmem [shape: f32[2,4,256], index: 0, kind: input, shape index: {}]   ;;  %s1850_s1 = inlined_call_operand.vmem [shape: f32[2,8,32], index: 1, kind: input, shape index: {}]   ;;  %s1851_s2 = inlined_call_operand.vmem [shape: f32[2,1,128], index: 2, kind: input, shape index: {}]   ;;  %s1852_s3 = inlined_call_operand.vmem [shape: f32[4,256], index: 3, kind: input, shape index: {}]   ;;  %s1853_s4 = inlined_call_operand.vmem [shape: f32[32,256], index: 4, kind: input, shape index: {}]   ;;  %s1854_s5 = inlined_call_operand.vmem [shape: f32[1,256], index: 5, kind: input, shape index: {}]   ;;  %s1855_s6 = inlined_call_operand.vmem [shape: f32[256,256], index: 6, kind: input, shape index: {}]   ;;  %s1856_s7 = inlined_call_operand.vmem [shape: f32[256,128], index: 7, kind: input, shape index: {}]   ;;  %s1857_s8 = inlined_call_operand.vmem [shape: f32[256,128], index: 8, kind: input, shape index: {}]   ;;  %s1858_s9 = inlined_call_operand.vmem [shape: f32[128,128], index: 9, kind: input, shape index: {}]   ;;  %s1859_s10 = inlined_call_operand.vmem [shape: f32[1,128], index: 10, kind: input, shape index: {}]   ;;  %s1860_s11 = inlined_call_operand.hbm [shape: f32[2,8,128], index: 11, kind: output, shape index: {0}]   ;;  %s1861_s12 = inlined_call_operand.vmem [shape: f32[2,1,128], index: 12, kind: output, shape index: {1}]  }
   0x1   :  { %1863 = sst [smem:[#allocation7_spill]] %s1849_s0 }
   0x2   :  { %1864 = sst [smem:[#allocation8_spill]] %s1850_s1 }
   0x3   :  { %18 = vsyncpa [#allocation3], 0 }
   0x4   :  { %20 = vsyncpa [#allocation3 + $0x1], 0  ;;  %s1279_s21 = smov 0   ;;  %s1281_s22 = smov 0  }
   0x5   :  { %s1283_s23 = smov 0   ;;  %s1285_s24 = smov 0  }
   0x6 LB: > { %1865 = sst [smem:[#allocation5_spill]] %s1207_s23  ;;  %s1300_s25 = sadd.s32 4294967295, %s1211_s24   ;;  %s1211_s24 = sphi %s1285_s24, %s1875_s24   ;;  %s1207_s23 = sphi %s1283_s23, %s1872_s23   ;;  %s1203_s22 = sphi %s1281_s22, %s1874_s22   ;;  %s1199_s21 = sphi %s1279_s21, %s1873_s21  }
   0x7   : > { %s1080_s26 = sadd.s32 4294967294, %s1211_s24   ;;  %s1304_s27 = sadd.s32 1, %s1211_s24  }
   0x8   : > { %s279_s28 = sadd.s32 1, %s1207_s23  ;;  %s276_s29 = ssub.s32 %s1211_s24, %s1304_s27 }
   0x9   : > { %p289_p0 = scmp.ne.s32.totalorder %s1207_s23, %s1203_s22  ;;  %p277_p1 = scmp.eq.s32.totalorder %s276_s29, 0 }
   0xa   : > { %p290_p2 = scmp.eq.s32.totalorder %s1300_s25, 1  ;;  %p295_p3 = scmp.ne.s32.totalorder %s1203_s22, %s1199_s21 }
   0xb   : > { %p296_p4 = scmp.eq.s32.totalorder %s1080_s26, 1  ;;  %p1083_p7 = scmp.ge.s32.totalorder %s1211_s24, 1 }
   0xc   : > { %s1315_s30 = scalar_select %p277_p1, %s1207_s23, %s279_s28  }
   0xd   : > { %p1317_p5 = por %p290_p2, %p289_p0  ;;  %p1321_p6 = por %p296_p4, %p295_p3 }
   0xe   : > { %1866 = sst [smem:[#allocation6_spill]] %s1315_s30  ;;  %p385_p8 = scmp.lt.s32.totalorder %s1211_s24, 3 }
  0x10   : > { %p386_p9 = pnand %p1083_p7, %p385_p8 }
  0x11   : > { %p437_p10 = scmp.lt.s32.totalorder (!%p386_p9), %s1300_s25, 1  ;;  %s1869_s0 = sld [smem:[#allocation7_spill]] (!%p386_p9) }
  0x12   : > { %389 = sbr.rel (%p386_p9) target bundleno = 874 (0x36a), region = 64  ;;  %s1870_s1 = sld [smem:[#allocation8_spill]] (!%p386_p9) }
  0x13   : > { %s429_s16 = sand.u32 (!%p386_p9), 1, %s1203_s22  }
  0x14   : > { %s1084_s17 = sshll.u32 (!%p386_p9), %s429_s16, 3  ;;  %s960_s26 = scalar_lea.sflag (!%p386_p9), [#allocation3], %s429_s16 }
  0x17   : > { %v536_v0 = vld [vmem:[%s1853_s4 + $0x30] sm:$0xff]  ;;  %v534_v1 = vld [vmem:[%s1853_s4 + $0x20] sm:$0xff]  ;;  %s1335_s19 = scalar_select %p437_p10, %s1300_s25, 1  ;;  %vm459_vm0 = vcmask 1043456   ;;  %vm538_vm1 = vcmask 261120   ;;  %v537_v12 = vld [vmem:[%s1853_s4 + $0x38] sm:$0xff]  ;;  %v475_v47 = vlaneseq }
  0x18   : > { %554 = vmatpush.msra.mxu2 %v536_v0  ;;  %v532_v2 = vld [vmem:[%s1853_s4 + $0x10] sm:$0xff]  ;;  %v530_v3 = vld [vmem:[%s1853_s4] sm:$0xff]  ;;  %574 = vmatpush.msra.mxu3 %v537_v12  ;;  %v535_v14 = vld [vmem:[%s1853_s4 + $0x28] sm:$0xff]  ;;  %v1213_v15 = vmov 256.0   ;;  %vm482_vm3 = vcmask 31744  }
  0x19   : > { %s1098_s28 = sshll.u32 %s1335_s19, 3  ;;  %v473_v5 = vld [vmem:[%s1852_s3] sm:$0xff]  ;;  %1141 = vrcp.f32 %v1213_v15  ;;  %v533_v17 = vld [vmem:[%s1853_s4 + $0x18] sm:$0xff]  ;;  %v531_v18 = vld [vmem:[%s1853_s4 + $0x8] sm:$0xff]  ;;  %v476_v53 = vand.u32 127, %v475_v47  ;;  %s448_s15 = scalar_lea.vmem %s1851_s2, %s1335_s19 }
  0x1a   : > { %555 = vmatpush.msra.mxu2 %v534_v1  ;;  %s441_s23 = scalar_lea.vmem %s1869_s0, %s1098_s28  ;;  %575 = vmatpush.msra.mxu3 %v535_v14  ;;  %v626_v20 = vld [vmem:[%s1855_s6 + $0xf0] sm:$0xff]  ;;  %v627_v21 = vld [vmem:[%s1855_s6 + $0xf8] sm:$0xff]  ;;  %v624_v22 = vld [vmem:[%s1855_s6 + $0xe0] sm:$0xff] }
  0x1b   : > { %v452_v4 = vld [vmem:[%s441_s23] sm:$0xff]  ;;  %s445_s23 = scalar_lea.vmem %s1870_s1, %s1098_s28  ;;  %660 = vmatpush.msra.mxu0 %v626_v20  ;;  %v625_v24 = vld [vmem:[%s1855_s6 + $0xe8] sm:$0xff]  ;;  %v622_v25 = vld [vmem:[%s1855_s6 + $0xd0] sm:$0xff]  ;;  %s1095_s28 = sshll.u32 %s1300_s25, 3 }
  0x1c   : > { %556 = vmatpush.msra.mxu2 %v532_v2  ;;  %454 = vst [vmem:[#allocation1] ss:$2 sm:$0xff] %v452_v4  ;;  %v529_v11 = vld [vmem:[%s445_s23] sm:$0xff]  ;;  %576 = vmatpush.msra.mxu3 %v533_v17  ;;  %v623_v26 = vld [vmem:[%s1855_s6 + $0xd8] sm:$0xff]  ;;  %v621_v29 = vld [vmem:[%s1855_s6 + $0xc8] sm:$0xff]  ;;  %s973_s20 = scalar_lea.hbm %s1860_s11, %s1095_s28  ;;  %s431_s23 = scalar_lea.vmem [#allocation2], %s1084_s17 }
  0x1d   : > { %661 = vmatpush.msra.mxu0 %v624_v22  ;;  %v659_v27 = vld [vmem:[%s1855_s6 + $0x1f8] sm:$0xff]  ;;  %v620_v28 = vld [vmem:[%s1855_s6 + $0xc0] sm:$0xff]  ;;  %v657_v31 = vld [vmem:[%s1855_s6 + $0x1e8] sm:$0xff]  ;;  %s975_s0 = sshll.u32 %s431_s23, 4  ;;  %s977_s1 = sshll.u32 %s973_s20, 4  ;;  %s976_s0 = int_to_ptr.vmem [resolvable:$true] %s975_s0  ;;  %s978_s1 = int_to_ptr.hbm [resolvable:$true] %s977_s1 }
  0x1e   : > { %557 = vmatpush.msra.mxu2 %v530_v3  ;;  %577 = vmatpush.msra.mxu3 %v531_v18  ;;  %v618_v32 = vld [vmem:[%s1855_s6 + $0xb0] sm:$0xff]  ;;  %v619_v33 = vld [vmem:[%s1855_s6 + $0xb8] sm:$0xff]  ;;  %v653_v35 = vld [vmem:[%s1855_s6 + $0x1c8] sm:$0xff]  ;;  %s1163_s29 = sshra.s32 %s978_s1, 4  ;;  %s1169_s17 = scalar_lea.hbm %s1860_s11, 16  ;;  %s1164_s29 = int_to_ptr.hbm [resolvable:$true] %s1163_s29 }
  0x1f   : > { %1092 = vmatmul.msk.f32.vlgmr.msra.gmra.mxu2 %vm538_vm1, %v529_v11  ;;  %1093 = vmatmul.msk.f32.vlgmr.msra.gmra.mxu3 %vm538_vm1, %v529_v11  ;;  %v1142_v19 = vpop.eup %1141  ;;  %v655_v34 = vld [vmem:[%s1855_s6 + $0x1d8] sm:$0xff]  ;;  %v616_v36 = vld [vmem:[%s1855_s6 + $0xa0] sm:$0xff]  ;;  %v617_v37 = vld [vmem:[%s1855_s6 + $0xa8] sm:$0xff]  ;;  %s1165_s25 = scalar_lea.hbm %s1164_s29, 8  ;;  %p1170_p0 = scmp.lt.s32.totalorder %s1164_s29, %s1860_s11 }
  0x20   : > { %v466_v23 = vmul.f32 256.0, %v1142_v19  ;;  %700 = vmatpush.msrb.mxu2 %v627_v21  ;;  %720 = vmatpush.msrb.mxu3 %v659_v27  ;;  %v651_v39 = vld [vmem:[%s1855_s6 + $0x1b8] sm:$0xff]  ;;  %v614_v40 = vld [vmem:[%s1855_s6 + $0x90] sm:$0xff]  ;;  %v649_v42 = vld [vmem:[%s1855_s6 + $0x1a8] sm:$0xff]  ;;  %vm470_vm2 = vweird.f32 %v1142_v19  ;;  %p1166_p11 = scmp.ne.s32.totalorder %s1164_s29, %s1165_s25  ;;  %p1171_p1 = scmp.lt.s32.totalorder %s1169_s17, %s1165_s25 }
  0x21   : > { %662 = vmatpush.msra.mxu0 %v622_v25  ;;  %v615_v41 = vld [vmem:[%s1855_s6 + $0x98] sm:$0xff]  ;;  %v612_v43 = vld [vmem:[%s1855_s6 + $0x80] sm:$0xff]  ;;  %v613_v44 = vld [vmem:[%s1855_s6 + $0x88] sm:$0xff] }
  0x22   : > { %701 = vmatpush.msrb.mxu2 %v625_v24  ;;  %v467_v30 = vsub.f32 1.0, %v466_v23  ;;  %721 = vmatpush.msrb.mxu3 %v657_v31  ;;  %v647_v46 = vld [vmem:[%s1855_s6 + $0x198] sm:$0xff]  ;;  %v610_v48 = vld [vmem:[%s1855_s6 + $0x70] sm:$0xff]  ;;  %v608_v50 = vld [vmem:[%s1855_s6 + $0x60] sm:$0xff]  ;;  %p1167_p12 = pnand %p1166_p11, %p1317_p5  ;;  %p1172_p2 = por %p1171_p1, %p1170_p0 }
  0x23   : > { %v455_v6 = vld.sshfl [vmem:[#allocation1] sm:$0xff pattern:$0x75316420]  ;;  %v456_v7 = vld.sshfl [vmem:[#allocation1 + $0x8] sm:$0xff pattern:$0x75316420]  ;;  %663 = vmatpush.msra.mxu0 %v620_v28 }
  0x24   : > { %v460_v8 = vsel %vm459_vm0, %v455_v6, 0.0  ;;  %v461_v9 = vsel %vm459_vm0, %v456_v7, 0.0  ;;  %479 = vst [vmem:[#allocation1] ss:$2 sm:$0xff] %v473_v5  ;;  %702 = vmatpush.msrb.mxu2 %v623_v26  ;;  %722 = vmatpush.msrb.mxu3 %v655_v34  ;;  %v468_v38 = vmul.f32 %v1142_v19, %v467_v30  ;;  %v611_v49 = vld [vmem:[%s1855_s6 + $0x78] sm:$0xff]  ;;  %v609_v51 = vld [vmem:[%s1855_s6 + $0x68] sm:$0xff]  ;;  %p1168_p13 = pneg %p1167_p12 }
  0x25   : > { %v462_v10 = vadd.f32 %v461_v9, %v460_v8  ;;  %664 = vmatpush.msra.mxu0 %v618_v32  ;;  %v606_v54 = vld [vmem:[%s1855_s6 + $0x50] sm:$0xff]  ;;  %v607_v55 = vld [vmem:[%s1855_s6 + $0x58] sm:$0xff]  ;;  %v656_v60 = vld [vmem:[%s1855_s6 + $0x1e0] sm:$0xff] }
  0x26   : > { %703 = vmatpush.msrb.mxu2 %v621_v29  ;;  %723 = vmatpush.msrb.mxu3 %v653_v35  ;;  %v469_v45 = vadd.f32 %v1142_v19, %v468_v38  ;;  %v658_v59 = vld [vmem:[%s1855_s6 + $0x1f0] sm:$0xff]  ;;  %v652_v62 = vld [vmem:[%s1855_s6 + $0x1c0] sm:$0xff]  ;;  %v605_v4 = vld [vmem:[%s1855_s6 + $0x48] sm:$0xff]  ;;  %p1173_p3 = pnand %p1172_p2, %p1168_p13 }
  0x27   : > { %463 = vadd.xlane.f32.xlu0 %v462_v10  ;;  %665 = vmatpush.msra.mxu0 %v616_v36  ;;  %v654_v61 = vld [vmem:[%s1855_s6 + $0x1d0] sm:$0xff]  ;;  %v648_v0 = vld [vmem:[%s1855_s6 + $0x1a0] sm:$0xff]  ;;  %v645_v5 = vld [vmem:[%s1855_s6 + $0x188] sm:$0xff] }
  0x28   : > { %704 = vmatpush.msrb.mxu2 %v619_v33  ;;  %724 = vmatpush.msrb.mxu3 %v651_v39  ;;  %v471_v52 = vsel %vm470_vm2, %v1142_v19, %v469_v45  ;;  %v650_v63 = vld [vmem:[%s1855_s6 + $0x1b0] sm:$0xff]  ;;  %v604_v2 = vld [vmem:[%s1855_s6 + $0x40] sm:$0xff]  ;;  %v603_v8 = vld [vmem:[%s1855_s6 + $0x38] sm:$0xff] }
  0x29   : > { %666 = vmatpush.msra.mxu0 %v614_v40  ;;  %v646_v1 = vld [vmem:[%s1855_s6 + $0x190] sm:$0xff]  ;;  %v644_v3 = vld [vmem:[%s1855_s6 + $0x180] sm:$0xff]  ;;  %v643_v9 = vld [vmem:[%s1855_s6 + $0x178] sm:$0xff] }
  0x2a   : > { %705 = vmatpush.msrb.mxu2 %v617_v37  ;;  %725 = vmatpush.msrb.mxu3 %v649_v42  ;;  %v602_v6 = vld [vmem:[%s1855_s6 + $0x30] sm:$0xff]  ;;  %v600_v10 = vld [vmem:[%s1855_s6 + $0x20] sm:$0xff]  ;;  %v601_v12 = vld [vmem:[%s1855_s6 + $0x28] sm:$0xff] }
  0x2b   : > { %v480_v13 = vld.sshfl [vmem:[#allocation1] sm:$0xff pattern:$0x75316420]  ;;  %v481_v16 = vld.sshfl [vmem:[#allocation1 + $0x8] sm:$0xff pattern:$0x75316420]  ;;  %667 = vmatpush.msra.mxu0 %v612_v43 }
  0x2c   : > { %1088 = vmatpush.msk.msra.mxu1 %vm459_vm0, %v480_v13  ;;  %706 = vmatpush.msrb.mxu2 %v615_v41  ;;  %v642_v7 = vld [vmem:[%s1855_s6 + $0x170] sm:$0xff]  ;;  %v640_v11 = vld [vmem:[%s1855_s6 + $0x160] sm:$0xff]  ;;  %v641_v13 = vld [vmem:[%s1855_s6 + $0x168] sm:$0xff] }
  0x2d   : > { %726 = vmatpush.msrb.mxu3 %v647_v46  ;;  %668 = vmatpush.msra.mxu0 %v610_v48  ;;  %v598_v14 = vld [vmem:[%s1855_s6 + $0x10] sm:$0xff]  ;;  %v639_v17 = vld [vmem:[%s1855_s6 + $0x158] sm:$0xff]  ;;  %v596_v18 = vld [vmem:[%s1855_s6] sm:$0xff] }
  0x2e   : > { %1090 = vmatpush.msk.msrb.mxu1 %vm459_vm0, %v481_v16  ;;  %707 = vmatpush.msrb.mxu2 %v613_v44  ;;  %v638_v15 = vld [vmem:[%s1855_s6 + $0x150] sm:$0xff]  ;;  %v599_v16 = vld [vmem:[%s1855_s6 + $0x18] sm:$0xff]  ;;  %v636_v19 = vld [vmem:[%s1855_s6 + $0x140] sm:$0xff] }
  0x2f   : > { %669 = vmatpush.msra.mxu0 %v608_v50  ;;  %727 = vmatpush.msrb.mxu3 %v645_v5  ;;  %v597_v20 = vld [vmem:[%s1855_s6 + $0x8] sm:$0xff]  ;;  %v634_v22 = vld [vmem:[%s1855_s6 + $0x130] sm:$0xff]  ;;  %v635_v23 = vld [vmem:[%s1855_s6 + $0x138] sm:$0xff] }
  0x30   : > { %708 = vmatpush.msrb.mxu2 %v611_v49  ;;  %v637_v21 = vld [vmem:[%s1855_s6 + $0x148] sm:$0xff]  ;;  %v632_v24 = vld [vmem:[%s1855_s6 + $0x120] sm:$0xff]  ;;  %v630_v26 = vld [vmem:[%s1855_s6 + $0x110] sm:$0xff] }
  0x31   : > { %670 = vmatpush.msra.mxu0 %v606_v54  ;;  %728 = vmatpush.msrb.mxu3 %v643_v9  ;;  %v633_v25 = vld [vmem:[%s1855_s6 + $0x128] sm:$0xff]  ;;  %v631_v27 = vld [vmem:[%s1855_s6 + $0x118] sm:$0xff]  ;;  %v628_v28 = vld [vmem:[%s1855_s6 + $0x100] sm:$0xff] }
  0x32   : > { %709 = vmatpush.msrb.mxu2 %v609_v51  ;;  %v629_v29 = vld [vmem:[%s1855_s6 + $0x108] sm:$0xff]  ;;  %v755_v30 = vld [vmem:[%s1856_s7 + $0x78] sm:$0xff]  ;;  %v754_v31 = vld [vmem:[%s1856_s7 + $0x70] sm:$0xff] }
  0x33   : > { %671 = vmatpush.msra.mxu0 %v604_v2  ;;  %729 = vmatpush.msrb.mxu3 %v641_v13  ;;  %v829_v32 = vld [vmem:[%s1857_s8 + $0x78] sm:$0xff]  ;;  %v828_v33 = vld [vmem:[%s1857_s8 + $0x70] sm:$0xff]  ;;  %v753_v34 = vld [vmem:[%s1856_s7 + $0x68] sm:$0xff] }
  0x34   : > { %710 = vmatpush.msrb.mxu2 %v607_v55  ;;  %v771_v35 = vld [vmem:[%s1856_s7 + $0xf8] sm:$0xff]  ;;  %v827_v36 = vld [vmem:[%s1857_s8 + $0x68] sm:$0xff]  ;;  %v770_v37 = vld [vmem:[%s1856_s7 + $0xf0] sm:$0xff] }
  0x35   : > { %672 = vmatpush.msra.mxu0 %v602_v6  ;;  %730 = vmatpush.msrb.mxu3 %v639_v17  ;;  %v845_v38 = vld [vmem:[%s1857_s8 + $0xf8] sm:$0xff]  ;;  %v752_v39 = vld [vmem:[%s1856_s7 + $0x60] sm:$0xff]  ;;  %v769_v41 = vld [vmem:[%s1856_s7 + $0xe8] sm:$0xff] }
  0x36   : > { %711 = vmatpush.msrb.mxu2 %v605_v4  ;;  %v826_v40 = vld [vmem:[%s1857_s8 + $0x60] sm:$0xff]  ;;  %v844_v42 = vld [vmem:[%s1857_s8 + $0xf0] sm:$0xff]  ;;  %v751_v43 = vld [vmem:[%s1856_s7 + $0x58] sm:$0xff] }
  0x37   : > { %673 = vmatpush.msra.mxu0 %v600_v10  ;;  %731 = vmatpush.msrb.mxu3 %v637_v21  ;;  %v825_v44 = vld [vmem:[%s1857_s8 + $0x58] sm:$0xff]  ;;  %v843_v45 = vld [vmem:[%s1857_s8 + $0xe8] sm:$0xff]  ;;  %v768_v46 = vld [vmem:[%s1856_s7 + $0xe0] sm:$0xff] }
  0x38   : > { %712 = vmatpush.msrb.mxu2 %v603_v8  ;;  %v842_v47 = vld [vmem:[%s1857_s8 + $0xe0] sm:$0xff]  ;;  %v750_v48 = vld [vmem:[%s1856_s7 + $0x50] sm:$0xff]  ;;  %v767_v50 = vld [vmem:[%s1856_s7 + $0xd8] sm:$0xff] }
  0x39   : > { %674 = vmatpush.msra.mxu0 %v598_v14  ;;  %732 = vmatpush.msrb.mxu3 %v635_v23  ;;  %v824_v49 = vld [vmem:[%s1857_s8 + $0x50] sm:$0xff]  ;;  %v841_v51 = vld [vmem:[%s1857_s8 + $0xd8] sm:$0xff]  ;;  %v745_v13 = vld [vmem:[%s1856_s7 + $0x28] sm:$0xff] }
  0x3a   : > { %713 = vmatpush.msrb.mxu2 %v601_v12  ;;  %v766_v54 = vld [vmem:[%s1856_s7 + $0xd0] sm:$0xff]  ;;  %v764_v14 = vld [vmem:[%s1856_s7 + $0xc0] sm:$0xff]  ;;  %v743_v21 = vld [vmem:[%s1856_s7 + $0x18] sm:$0xff] }
  0x3b   : > { %675 = vmatpush.msra.mxu0 %v596_v18  ;;  %733 = vmatpush.msrb.mxu3 %v633_v25  ;;  %v840_v55 = vld [vmem:[%s1857_s8 + $0xd0] sm:$0xff]  ;;  %v744_v17 = vld [vmem:[%s1856_s7 + $0x20] sm:$0xff]  ;;  %v763_v18 = vld [vmem:[%s1856_s7 + $0xb8] sm:$0xff] }
  0x3c   : > { %714 = vmatpush.msrb.mxu2 %v599_v16  ;;  %v746_v2 = vld [vmem:[%s1856_s7 + $0x30] sm:$0xff]  ;;  %v839_v16 = vld [vmem:[%s1857_s8 + $0xc8] sm:$0xff]  ;;  %v818_v23 = vld [vmem:[%s1857_s8 + $0x20] sm:$0xff] }
  0x3d   : > { %734 = vmatpush.msrb.mxu3 %v631_v27  ;;  %772 = vmatpush.msrb.mxu0 %v755_v30  ;;  %v742_v25 = vld [vmem:[%s1856_s7 + $0x10] sm:$0xff]  ;;  %v817_v27 = vld [vmem:[%s1857_s8 + $0x18] sm:$0xff]  ;;  %v760_v30 = vld [vmem:[%s1856_s7 + $0xa0] sm:$0xff] }
  0x3e   : > { %715 = vmatpush.msrb.mxu2 %v597_v20  ;;  %v838_v20 = vld [vmem:[%s1857_s8 + $0xc0] sm:$0xff] }
  0x3f   : > { %735 = vmatpush.msrb.mxu3 %v629_v29  ;;  %773 = vmatpush.msrb.mxu0 %v754_v31  ;;  %v741_v29 = vld [vmem:[%s1856_s7 + $0x8] sm:$0xff]  ;;  %v816_v31 = vld [vmem:[%s1857_s8 + $0x10] sm:$0xff] }
  0x40   : > { %846 = vmatpush.msra.mxu2 %v829_v32  ;;  %v835_v32 = vld [vmem:[%s1857_s8 + $0xa8] sm:$0xff] }
  0x41   : > { %866 = vmatpush.msra.mxu3 %v845_v38  ;;  %774 = vmatpush.msrb.mxu0 %v753_v34  ;;  %v759_v34 = vld [vmem:[%s1856_s7 + $0x98] sm:$0xff]  ;;  %v814_v38 = vld [vmem:[%s1857_s8] sm:$0xff] }
  0x42   : > { %847 = vmatpush.msra.mxu2 %v828_v33  ;;  %v740_v33 = vld [vmem:[%s1856_s7] sm:$0xff] }
  0x43   : > { %867 = vmatpush.msra.mxu3 %v844_v42  ;;  %775 = vmatpush.msrb.mxu0 %v752_v39  ;;  %v833_v39 = vld [vmem:[%s1857_s8 + $0x98] sm:$0xff]  ;;  %v756_v42 = vld [vmem:[%s1856_s7 + $0x80] sm:$0xff] }
  0x44   : > { %848 = vmatpush.msra.mxu2 %v827_v36  ;;  %v834_v36 = vld [vmem:[%s1857_s8 + $0xa0] sm:$0xff] }
  0x45   : > { %868 = vmatpush.msra.mxu3 %v843_v45  ;;  %776 = vmatpush.msrb.mxu0 %v751_v43  ;;  %v831_v43 = vld [vmem:[%s1857_s8 + $0x88] sm:$0xff] }
  0x46   : > { %849 = vmatpush.msra.mxu2 %v826_v40  ;;  %v757_v40 = vld [vmem:[%s1856_s7 + $0x88] sm:$0xff] }
  0x47   : > { %869 = vmatpush.msra.mxu3 %v842_v47  ;;  %777 = vmatpush.msrb.mxu0 %v750_v48 }
  0x48   : > { %850 = vmatpush.msra.mxu2 %v825_v44  ;;  %v830_v44 = vld [vmem:[%s1857_s8 + $0x80] sm:$0xff] }
  0x49   : > { %870 = vmatpush.msra.mxu3 %v841_v51 }
  0x4a   : > { %851 = vmatpush.msra.mxu2 %v824_v49 }
  0x4b   : > { %871 = vmatpush.msra.mxu3 %v840_v55 }
  0x4d   : > { %872 = vmatpush.msra.mxu3 %v839_v16 }
  0x4f   : > { %873 = vmatpush.msra.mxu3 %v838_v20  ;;  %v910_v20 = vld [vmem:[%s1858_s9 + $0x10] sm:$0xff] }
  0x9a   : > { %v464_v56 = vpop.xlane.xlu0 %463 }
  0x9b   : > { %v472_v57 = vmul.f32 %v471_v52, %v464_v56  ;;  %v749_v52 = vld [vmem:[%s1856_s7 + $0x48] sm:$0xff]  ;;  %v748_v56 = vld [vmem:[%s1856_s7 + $0x40] sm:$0xff] }
  0x9c   : > { %778 = vmatpush.msrb.mxu0 %v749_v52 }
  0x9d   : > { %v477_v58 = vperm.slane %v472_v57, %v476_v53  ;;  %v823_v53 = vld [vmem:[%s1857_s8 + $0x48] sm:$0xff]  ;;  %v822_v57 = vld [vmem:[%s1857_s8 + $0x40] sm:$0xff] }
  0x9e   : > { %852 = vmatpush.msra.mxu2 %v823_v53  ;;  %779 = vmatpush.msrb.mxu0 %v748_v56  ;;  %v923_v53 = vld [vmem:[%s1858_s9 + $0x78] sm:$0xff]  ;;  %v921_v56 = vld [vmem:[%s1858_s9 + $0x68] sm:$0xff] }
  0x9f   : > { %1089 = vmatmul.msk.f32.vlgmr.msra.gmra.mxu1 %vm482_vm3, %v477_v58 }
  0xa0   : > { %680 = vmatpush.msra.mxu1 %v658_v59  ;;  %v765_v59 = vld [vmem:[%s1856_s7 + $0xc8] sm:$0xff]  ;;  %853 = vmatpush.msra.mxu2 %v822_v57 }
  0xa2   : > { %681 = vmatpush.msra.mxu1 %v656_v60  ;;  %v747_v60 = vld [vmem:[%s1856_s7 + $0x38] sm:$0xff] }
  0xa3   : > { %780 = vmatpush.msrb.mxu0 %v747_v60 }
  0xa4   : > { %682 = vmatpush.msra.mxu1 %v654_v61  ;;  %v821_v61 = vld [vmem:[%s1857_s8 + $0x38] sm:$0xff] }
  0xa5   : > { %854 = vmatpush.msra.mxu2 %v821_v61  ;;  %781 = vmatpush.msrb.mxu0 %v746_v2  ;;  %v919_v61 = vld [vmem:[%s1858_s9 + $0x58] sm:$0xff] }
  0xa6   : > { %683 = vmatpush.msra.mxu1 %v652_v62  ;;  %v915_v2 = vld [vmem:[%s1858_s9 + $0x38] sm:$0xff] }
  0xa7   : > { %1091 = vmatmul.msk.f32.vlgmr.msrb.gmra.mxu1 %vm482_vm3, %v477_v58  ;;  %v586_v58 = vld [vmem:[%s1854_s5] sm:$0x3]  ;;  %782 = vmatpush.msrb.mxu0 %v745_v13 }
  0xa8   : > { %684 = vmatpush.msra.mxu1 %v650_v63  ;;  %v559_v63 = vpop.f32.mrf.mxu2  ;;  %v589_v9 = vperm.slane %v586_v58, 1 }
  0xa9   : > { %783 = vmatpush.msrb.mxu0 %v744_v17  ;;  %v913_v17 = vld [vmem:[%s1858_s9 + $0x28] sm:$0xff] }
  0xaa   : > { %685 = vmatpush.msra.mxu1 %v648_v0 }
  0xab   : > { %784 = vmatpush.msrb.mxu0 %v743_v21  ;;  %v909_v21 = vld [vmem:[%s1858_s9 + $0x8] sm:$0xff] }
  0xac   : > { %686 = vmatpush.msra.mxu1 %v646_v1  ;;  %v588_v1 = vperm.slane %v586_v58, 0  ;;  %v920_v58 = vld [vmem:[%s1858_s9 + $0x60] sm:$0xff] }
  0xad   : > { %785 = vmatpush.msrb.mxu0 %v742_v25 }
  0xae   : > { %687 = vmatpush.msra.mxu1 %v644_v3 }
  0xaf   : > { %786 = vmatpush.msrb.mxu0 %v741_v29  ;;  %v1140_v29 = vld [vmem:[%s448_s15] ss:$0 sm:$0xff] }
  0xb0   : > { %688 = vmatpush.msra.mxu1 %v642_v7  ;;  %v579_v7 = vpop.f32.mrf.mxu3 }
  0xb1   : > { %787 = vmatpush.msrb.mxu0 %v740_v33 }
  0xb2   : > { %689 = vmatpush.msra.mxu1 %v640_v11 }
  0xb4   : > { %690 = vmatpush.msra.mxu1 %v638_v15  ;;  %v820_v15 = vld [vmem:[%s1857_s8 + $0x30] sm:$0xff] }
  0xb5   : > { %855 = vmatpush.msra.mxu2 %v820_v15 }
  0xb6   : > { %691 = vmatpush.msra.mxu1 %v636_v19  ;;  %v819_v19 = vld [vmem:[%s1857_s8 + $0x28] sm:$0xff] }
  0xb7   : > { %856 = vmatpush.msra.mxu2 %v819_v19  ;;  %v911_v19 = vld [vmem:[%s1858_s9 + $0x18] sm:$0xff] }
  0xb8   : > { %692 = vmatpush.msra.mxu1 %v634_v22  ;;  %v762_v22 = vld [vmem:[%s1856_s7 + $0xb0] sm:$0xff] }
  0xb9   : > { %857 = vmatpush.msra.mxu2 %v818_v23 }
  0xba   : > { %693 = vmatpush.msra.mxu1 %v632_v24  ;;  %v837_v24 = vld [vmem:[%s1857_s8 + $0xb8] sm:$0xff] }
  0xbb   : > { %874 = vmatpush.msra.mxu3 %v837_v24  ;;  %858 = vmatpush.msra.mxu2 %v817_v27 }
  0xbc   : > { %694 = vmatpush.msra.mxu1 %v630_v26  ;;  %v761_v26 = vld [vmem:[%s1856_s7 + $0xa8] sm:$0xff] }
  0xbd   : > { %859 = vmatpush.msra.mxu2 %v816_v31 }
  0xbe   : > { %695 = vmatpush.msra.mxu1 %v628_v28  ;;  %v836_v28 = vld [vmem:[%s1857_s8 + $0xb0] sm:$0xff] }
  0xbf   : > { %875 = vmatpush.msra.mxu3 %v836_v28 }
  0xc0   : > { %792 = vmatpush.msrb.mxu1 %v771_v35  ;;  %v815_v35 = vld [vmem:[%s1857_s8 + $0x8] sm:$0xff] }
  0xc1   : > { %876 = vmatpush.msra.mxu3 %v835_v32  ;;  %860 = vmatpush.msra.mxu2 %v815_v35 }
  0xc2   : > { %793 = vmatpush.msrb.mxu1 %v770_v37  ;;  %v758_v37 = vld [vmem:[%s1856_s7 + $0x90] sm:$0xff] }
  0xc3   : > { %877 = vmatpush.msra.mxu3 %v834_v36  ;;  %861 = vmatpush.msra.mxu2 %v814_v38 }
  0xc4   : > { %794 = vmatpush.msrb.mxu1 %v769_v41  ;;  %v832_v41 = vld [vmem:[%s1857_s8 + $0x90] sm:$0xff] }
  0xc5   : > { %878 = vmatpush.msra.mxu3 %v833_v39 }
  0xc6   : > { %795 = vmatpush.msrb.mxu1 %v768_v46 }
  0xc7   : > { %879 = vmatpush.msra.mxu3 %v832_v41 }
  0xc8   : > { %796 = vmatpush.msrb.mxu1 %v767_v50 }
  0xc9   : > { %880 = vmatpush.msra.mxu3 %v831_v43 }
  0xca   : > { %797 = vmatpush.msrb.mxu1 %v766_v54  ;;  %v922_v54 = vld [vmem:[%s1858_s9 + $0x70] sm:$0xff] }
  0xcb   : > { %881 = vmatpush.msra.mxu3 %v830_v44 }
  0xcc   : > { %798 = vmatpush.msrb.mxu1 %v765_v59 }
  0xce   : > { %799 = vmatpush.msrb.mxu1 %v764_v14  ;;  %v1139_v14 = vld [vmem:[%s1859_s10] ss:$0 sm:$0xff] }
  0xd0   : > { %800 = vmatpush.msrb.mxu1 %v763_v18  ;;  %v912_v18 = vld [vmem:[%s1858_s9 + $0x20] sm:$0xff] }
  0xd2   : > { %801 = vmatpush.msrb.mxu1 %v762_v22  ;;  %v908_v22 = vld [vmem:[%s1858_s9] sm:$0xff] }
  0xd4   : > { %802 = vmatpush.msrb.mxu1 %v761_v26 }
  0xd6   : > { %803 = vmatpush.msrb.mxu1 %v760_v30 }
  0xd8   : > { %804 = vmatpush.msrb.mxu1 %v759_v34 }
  0xda   : > { %805 = vmatpush.msrb.mxu1 %v758_v37 }
  0xdc   : > { %806 = vmatpush.msrb.mxu1 %v757_v40 }
  0xde   : > { %807 = vmatpush.msrb.mxu1 %v756_v42 }
 0x11c   : > { %v506_v62 = vpop.f32.mrf.mxu1 }
 0x11d   : > { %v582_v0 = vperm.slane %v506_v62, 0  ;;  %v918_v62 = vld [vmem:[%s1858_s9 + $0x50] sm:$0xff] }
 0x11f   : > { %v584_v3 = vadd.f32 %v582_v0, %v559_v63  ;;  %v917_v63 = vld [vmem:[%s1858_s9 + $0x48] sm:$0xff]  ;;  %v916_v0 = vld [vmem:[%s1858_s9 + $0x40] sm:$0xff] }
 0x121   : > { %v592_v4 = vadd.f32 %v588_v1, %v584_v3 }
 0x123   : > { %v594_v5 = vmax.f32 %v592_v4, 0.0  ;;  %v914_v4 = vld [vmem:[%s1858_s9 + $0x30] sm:$0xff] }
 0x124   : > { %v526_v6 = vpop.f32.mrf.mxu1 }
 0x125   : > { %v583_v8 = vperm.slane %v526_v6, 0  ;;  %676 = vmatmul.f32.vlgmr.msra.gmra.mxu0 %v594_v5  ;;  %716 = vmatmul.f32.vlgmr.msrb.gmra.mxu2 %v594_v5 }
 0x126   : > { %924 = vmatpush.msra.mxu0 %v923_v53 }
 0x127   : > { %v585_v10 = vadd.f32 %v583_v8, %v579_v7 }
 0x128   : > { %925 = vmatpush.msra.mxu0 %v922_v54 }
 0x129   : > { %v593_v11 = vadd.f32 %v589_v9, %v585_v10 }
 0x12a   : > { %926 = vmatpush.msra.mxu0 %v921_v56 }
 0x12b   : > { %v595_v12 = vmax.f32 %v593_v11, 0.0 }
 0x12c   : > { %927 = vmatpush.msra.mxu0 %v920_v58 }
 0x12d   : > { %696 = vmatmul.f32.vlgmr.msra.gmra.mxu1 %v595_v12  ;;  %736 = vmatmul.f32.vlgmr.msrb.gmra.mxu3 %v595_v12 }
 0x12e   : > { %928 = vmatpush.msra.mxu0 %v919_v61 }
 0x130   : > { %929 = vmatpush.msra.mxu0 %v918_v62 }
 0x132   : > { %930 = vmatpush.msra.mxu0 %v917_v63 }
 0x134   : > { %931 = vmatpush.msra.mxu0 %v916_v0 }
 0x136   : > { %932 = vmatpush.msra.mxu0 %v915_v2 }
 0x138   : > { %933 = vmatpush.msra.mxu0 %v914_v4 }
 0x13a   : > { %934 = vmatpush.msra.mxu0 %v913_v17 }
 0x13c   : > { %935 = vmatpush.msra.mxu0 %v912_v18 }
 0x13e   : > { %936 = vmatpush.msra.mxu0 %v911_v19 }
 0x140   : > { %937 = vmatpush.msra.mxu0 %v910_v20 }
 0x142   : > { %938 = vmatpush.msra.mxu0 %v909_v21 }
 0x144   : > { %939 = vmatpush.msra.mxu0 %v908_v22 }
 0x1a2   : > { %v677_v45 = vpop.f32.mrf.mxu0 }
 0x1a8   : > { %v717_v49 = vpop.f32.mrf.mxu2 }
 0x1aa   : > { %v697_v46 = vpop.f32.mrf.mxu1 }
 0x1ab   : > { %v698_v47 = vadd.f32 %v697_v46, %v677_v45 }
 0x1ad   : > { %v812_v48 = vmul.f32 %v698_v47, %v698_v47  ;;  %788 = vmatmul.f32.vlgmr.msrb.gmra.mxu0 %v698_v47 }
 0x1af   : > { %862 = vmatmul.f32.vlgmr.msra.gmra.mxu2 %v812_v48 }
 0x1b0   : > { %v737_v50 = vpop.f32.mrf.mxu3 }
 0x1b1   : > { %v738_v51 = vadd.f32 %v737_v50, %v717_v49 }
 0x1b3   : > { %v813_v52 = vmul.f32 %v738_v51, %v738_v51  ;;  %808 = vmatmul.f32.vlgmr.msrb.gmra.mxu1 %v738_v51 }
 0x1b5   : > { %882 = vmatmul.f32.vlgmr.msra.gmra.mxu3 %v813_v52 }
 0x22a   : > { %v789_v9 = vpop.f32.mrf.mxu0 }
 0x230   : > { %v809_v7 = vpop.f32.mrf.mxu1 }
 0x231   : > { %v810_v11 = vadd.f32 %v809_v7, %v789_v9 }
 0x232   : > { %v863_v55 = vpop.f32.mrf.mxu2 }
 0x233   : > { %v864_v57 = vadd.f32 1e-06, %v863_v55 }
 0x238   : > { %v883_v59 = vpop.f32.mrf.mxu3 }
 0x239   : > { %v884_v60 = vadd.f32 %v883_v59, %v864_v57 }
 0x23b   : > { %1143 = vrsqrt.f32 %v884_v60  ;;  %vm892_vm5 = vweird.f32 %v884_v60 }
 0x241   : > { %v1144_v1 = vpop.eup %1143 }
 0x242   : > { %v887_v3 = vmul.f32 %v1144_v1, %v884_v60  ;;  %vm893_vm4 = vweird.f32 %v1144_v1 }
 0x243   : > { %vm894_vm6 = vmor %vm892_vm5, %vm893_vm4 }
 0x244   : > { %v888_v5 = vmul.f32 %v1144_v1, %v887_v3 }
 0x246   : > { %v889_v6 = vmul.f32 0.5, %v888_v5 }
 0x248   : > { %v890_v8 = vsub.f32 1.5, %v889_v6 }
 0x24a   : > { %v891_v10 = vmul.f32 %v1144_v1, %v890_v8 }
 0x24c   : > { %v895_v12 = vsel %vm894_vm6, %v1144_v1, %v891_v10 }
 0x24d   : > { %v896_v13 = vmul.f32 %v895_v12, %v810_v11 }
 0x24f   : > { %v897_v15 = vmul.f32 10.0, %v896_v13 }
 0x251   : > { %v902_v16 = vadd.f32 %v1139_v14, %v897_v15 }
 0x253   : > { %903 = vmax.xlane.f32.xlu0 %v902_v16 }
 0x2c6   : > { %v904_v23 = vpop.xlane.xlu0 %903 }
 0x2c7   : > { %v905_v24 = vsub.f32 %v902_v16, %v904_v23 }
 0x2c9   : > { %v906_v25 = vmul.f32 1.442695, %v905_v24 }
 0x2cb   : > { %1145 = vpow2.f32 %v906_v25 }
 0x2d1   : > { %v1146_v26 = vpop.eup %1145 }
 0x2d2   : > { %940 = vmatmul.f32.vlgmr.msra.gmra.mxu0 %v1146_v26 }
 0x34f   : > { %v941_v27 = vpop.f32.mrf.mxu0 }
 0x350   : > { %v942_v28 = vadd.f32 1e-30, %v941_v27 }
 0x352   : > { %1147 = vrcp.f32 %v942_v28 }
 0x358   : > { %v1148_v30 = vpop.eup %1147 }
 0x359   : > { %v945_v31 = vmul.f32 %v1148_v30, %v1146_v26 }
 0x35b   : > { %946 = vst [vmem:[%s431_s23] sm:$0xff] %v945_v31  ;;  %v951_v32 = vmul.f32 %v1140_v29, %v945_v31 }
 0x35c   : > { %1176 = shalt.err (!%p1173_p3)
}
 0x35d   : > { %1099 = dma.vmem_to_hbm [thread:$0]  (%p1317_p5), %s976_s0, 128, %s978_s1, %s960_s26   ;;  %v952_v33 = vrot.slane %v951_v32, 4 }
 0x35e   : > { %s451_s23 = scalar_lea.vmem %s1861_s12, %s1335_s19 }
 0x35f   : > { %v953_v34 = vadd.f32 %v952_v33, %v951_v32 }
 0x361   : > { %v954_v35 = vrot.slane %v953_v34, 2 }
 0x363   : > { %v955_v36 = vadd.f32 %v954_v35, %v953_v34 }
 0x365   : > { %v956_v37 = vrot.slane %v955_v36, 1 }
 0x367   : > { %v957_v38 = vadd.f32 %v956_v37, %v955_v36 }
 0x369   : > { %958 = vst [vmem:[%s451_s23] sm:$0x1] %v957_v38 }
 0x36a PF: > { %p1105_p4 = scmp.ge.s32.totalorder %s1211_s24, 2  ;;  %s992_s29 = sand.u32 1, %s1199_s21  }
 0x36b   : > { %s993_s0 = scalar_lea.sflag [#allocation3], %s992_s29 }
 0x36c   : > { %p1102_p7 = pnand %p1105_p4, %p1321_p6 }
 0x36e   : > { %p1103_p5 = pneg %p1102_p7 }
 0x370   : > { %1194 = dma.done.wait (%p1103_p5), %s993_s0, 128  }
 0x371   : > { %1196 = vsyncadd (%p1103_p5), %s993_s0, 4294967168  ;;  %s1871_s1 = sld [smem:[#allocation5_spill]]  ;;  %p23_p8 = scmp.ge.s32.totalorder %s1304_s27, 4  }
 0x372   : > { %s1872_s23 = sld [smem:[#allocation6_spill]]  ;;  %s1873_s21 = smov %s1203_s22 }
 0x373   : > { %s1875_s24 = smov %s1304_s27  ;;  %25 = sbr.rel (!%p23_p8) target bundleno = 6 (0x6), region = 117 }
 0x377   : > { %s1874_s22 = smov %s1871_s1 }
 0x378   :  { %1005 = vsyncpa [#allocation3], 1 }
 0x379   :  { %1007 = vsyncpa [#allocation3 + $0x1], 1 }

</bundles_post_ra>
